<compile_context>
chip_gen: v6e
topology: v6e:2x2x1
jax: 0.10.0
libtpu: 0.0.40
codegen_flags: <defaults>
</compile_context>

<pallas_src>
import jax
import jax.numpy as jnp
from jax.experimental import pallas as pl
from jax.experimental.pallas import tpu as pltpu


def _mlp_t_kernel(x_ref, w1_ref, b1_ref, w2_ref, b2_ref, w3_ref, b3_ref, o_ref):
    """Feature-major 3-layer MLP. x_ref is (in_dim, TB): batch on lanes.

    h1 = relu(W1 @ x + b1); h2 = relu(W2 @ h1 + b2); out = W3 @ h2 + b3.
    Dots accumulate in f32; MXU operands take the weight dtype (f32 or bf16);
    biases are f32 (out, 1) columns broadcast over lanes; stores are f32 and
    lane-dense.
    """
    x = x_ref[...]
    h1 = jnp.dot(w1_ref[...], x, preferred_element_type=jnp.float32) + b1_ref[...]
    h1 = jnp.maximum(h1, 0.0).astype(w2_ref.dtype)

    h2 = jnp.dot(w2_ref[...], h1, preferred_element_type=jnp.float32) + b2_ref[...]
    h2 = jnp.maximum(h2, 0.0).astype(w3_ref.dtype)

    o_ref[...] = (jnp.dot(w3_ref[...], h2, preferred_element_type=jnp.float32)
                  + b3_ref[...]).astype(o_ref.dtype)


def _pick_batch_tile(B, batch_tile):
    """Lane (batch) tile: full batch if small; otherwise a multiple of 128,
    capped at `batch_tile`, and sized so the grid has >= 2 steps (so the
    'parallel' axis shards across v7x's two TensorCores)."""
    if B <= 256:
        return B                        # single block == full dim: no (8,128) rule
    half = pl.cdiv(B, 2)
    half = pl.cdiv(half, 128) * 128     # round half-batch up to a lane multiple
    tb = min(int(batch_tile), half)
    tb = max(128, tb - tb % 128)
    return tb


def low_level_policy_forward(model_obs, latent_action, params, *,
                             batch_tile=2048, compute_dtype=jnp.float32):
    """Runs the 3-layer trunk MLP on (model_obs, latent_action) in one Pallas kernel.

    params are PyTorch-layout: (w1, b1, w2, b2, w3, b3) with w_i of shape
    (out_features, in_features) and b_i of shape (out_features,).
    Returns (B, out_dim) float32, matching the PyTorch module.
    """
    w1, b1, w2, b2, w3, b3 = params
    B = model_obs.shape[0]
    in_dim = w1.shape[1]
    hid = w1.shape[0]
    out_dim = w3.shape[0]
    assert model_obs.shape[1] + latent_action.shape[1] == in_dim

    # Fuse concat + transpose in the wrapper: one feature-major (in_dim, B)
    # slab with the batch on the lane axis.
    x_t = jnp.concatenate([model_obs, latent_action], axis=1).T
    x_t = x_t.astype(compute_dtype)

    # PyTorch (out, in) weight layout is exactly what the transposed kernel
    # wants.  Biases become (out, 1) columns and stay f32 (post-accum add).
    w1c, w2c, w3c = (w.astype(compute_dtype) for w in (w1, w2, w3))
    b1c = b1.reshape(-1, 1).astype(jnp.float32)
    b2c = b2.reshape(-1, 1).astype(jnp.float32)
    b3c = b3.reshape(-1, 1).astype(jnp.float32)

    tb = _pick_batch_tile(B, batch_tile)
    grid = (pl.cdiv(B, tb),)

    def resident(a):
        # Same block every grid step -> weights/biases stay VMEM-resident.
        return pl.BlockSpec(a.shape, lambda i: (0,) * a.ndim)

    itemsize = jnp.dtype(compute_dtype).itemsize
    cost = pl.CostEstimate(
        flops=2 * B * (in_dim * hid + hid * hid + hid * out_dim),
        transcendentals=0,
        bytes_accessed=int(B * in_dim * itemsize + B * out_dim * 4
                           + (w1c.size + w2c.size + w3c.size) * itemsize
                           + (b1c.size + b2c.size + b3c.size) * 4),
    )

    out_t = pl.pallas_call(
        _mlp_t_kernel,
        out_shape=jax.ShapeDtypeStruct((out_dim, B), jnp.float32),
        grid=grid,
        in_specs=[
            pl.BlockSpec((in_dim, tb), lambda i: (0, i)),   # activations, batch-tiled
            resident(w1c), resident(b1c),
            resident(w2c), resident(b2c),
            resident(w3c), resident(b3c),
        ],
        out_specs=pl.BlockSpec((out_dim, tb), lambda i: (0, i)),
        compiler_params=pltpu.CompilerParams(
            dimension_semantics=("parallel",),   # megacore-shard the batch (v7x)
            vmem_limit_bytes=32 * 1024 * 1024,   # safe on v5e/v6e/v7x
        ),
        cost_estimate=cost,
    )(x_t, w1c, b1c, w2c, b2c, w3c, b3c)

    # Back to the module's (B, out_dim) layout (wrapper-side layout plumbing;
    # the lane-dense in-kernel stores are what matters at large B).
    return out_t.T


def init_params(key, model_obs_dim, z_dim, model_output_dim, model_hidden_num):
    """Deterministic synthetic init, PyTorch-Linear-like uniform(-1/sqrt(in), 1/sqrt(in)).

    Weights stored in PyTorch layout: (out_features, in_features)."""
    in_dim = model_obs_dim + z_dim
    dims = [(model_hidden_num, in_dim),
            (model_hidden_num, model_hidden_num),
            (model_output_dim, model_hidden_num)]
    params = []
    for (dout, din) in dims:
        key, kw, kb = jax.random.split(key, 3)
        bound = 1.0 / (din ** 0.5)
        w = jax.random.uniform(kw, (dout, din), jnp.float32, -bound, bound)
        b = jax.random.uniform(kb, (dout,), jnp.float32, -bound, bound)
        params += [w, b]
    return tuple(params)


def _reference(model_obs, latent_action, params):
    w1, b1, w2, b2, w3, b3 = params
    x = jnp.concatenate([model_obs, latent_action], axis=1)
    h = jnp.maximum(x @ w1.T + b1, 0.0)
    h = jnp.maximum(h @ w2.T + b2, 0.0)
    return h @ w3.T + b3


if __name__ == "__main__":
    model_obs_dim = 12
    z_dim = 4
    model_hidden_num = 32
    model_output_dim = 8

    key = jax.random.PRNGKey(0)
    k_params, k1, k2, k3, k4 = jax.random.split(key, 5)
    params = init_params(k_params, model_obs_dim, z_dim,
                         model_output_dim, model_hidden_num)

    # --- Small batch (module's typical `predict` use; single grid step) ---
    B = 4
    obs = jax.random.normal(k1, (B, model_obs_dim), jnp.float32)
    lat = jax.random.normal(k2, (B, z_dim), jnp.float32)
    out = jax.block_until_ready(low_level_policy_forward(obs, lat, params))
    ref = _reference(obs, lat, params)
    assert out.shape == (B, model_output_dim)
    assert jnp.allclose(out, ref, atol=1e-5, rtol=1e-5)

    # --- Larger, non-tile-multiple batch: >=2 grid steps + partial tail block ---
    Bb = 1000
    obs_b = jax.random.normal(k3, (Bb, model_obs_dim), jnp.float32)
    lat_b = jax.random.normal(k4, (Bb, z_dim), jnp.float32)
    out_b = jax.block_until_ready(low_level_policy_forward(obs_b, lat_b, params))
    ref_b = _reference(obs_b, lat_b, params)
    assert out_b.shape == (Bb, model_output_dim)
    assert jnp.allclose(out_b, ref_b, atol=1e-5, rtol=1e-5)

    # --- bf16-I/O throughput path (HBM-bound regime), f32 accumulate/store ---
    out_h = jax.block_until_ready(
        low_level_policy_forward(obs_b, lat_b, params, compute_dtype=jnp.bfloat16))
    assert out_h.shape == (Bb, model_output_dim)
    assert float(jnp.max(jnp.abs(out_h - ref_b))) < 0.1

    print("KERNEL_OK")
</pallas_src>

<mosaic_0001>
module attributes {stable_mosaic.version = 11 : i64} {
  func.func @_mlp_t_kernel(%arg0: i32, %arg1: memref<16x4xf32, #tpu.memory_space<vmem>>, %arg2: memref<32x16xf32, #tpu.memory_space<vmem>>, %arg3: memref<32x1xf32, #tpu.memory_space<vmem>>, %arg4: memref<32x32xf32, #tpu.memory_space<vmem>>, %arg5: memref<32x1xf32, #tpu.memory_space<vmem>>, %arg6: memref<8x32xf32, #tpu.memory_space<vmem>>, %arg7: memref<8x1xf32, #tpu.memory_space<vmem>>, %arg8: memref<8x4xf32, #tpu.memory_space<vmem>>) attributes {dimension_semantics = [#tpu.dimension_semantics<parallel>], iteration_bounds = array<i64: 1>, scalar_prefetch = 0 : i64, scratch_operands = 0 : i64, tpu.core_type = #tpu.core_type<tc>, window_params = [{transform_indices = @transform_0, window_bounds = array<i64: 16, 4>}, {pipeline_mode = #tpu.pipeline_mode<synchronous>, transform_indices = @transform_1, window_bounds = array<i64: 32, 16>}, {pipeline_mode = #tpu.pipeline_mode<synchronous>, transform_indices = @transform_2, window_bounds = array<i64: 32, 1>}, {pipeline_mode = #tpu.pipeline_mode<synchronous>, transform_indices = @transform_3, window_bounds = array<i64: 32, 32>}, {pipeline_mode = #tpu.pipeline_mode<synchronous>, transform_indices = @transform_4, window_bounds = array<i64: 32, 1>}, {pipeline_mode = #tpu.pipeline_mode<synchronous>, transform_indices = @transform_5, window_bounds = array<i64: 8, 32>}, {pipeline_mode = #tpu.pipeline_mode<synchronous>, transform_indices = @transform_6, window_bounds = array<i64: 8, 1>}, {transform_indices = @transform_7, window_bounds = array<i64: 8, 4>}]} {
    %c0 = arith.constant 0 : index
    %c0_0 = arith.constant 0 : index
    %0 = vector.load %arg1[%c0, %c0_0] : memref<16x4xf32, #tpu.memory_space<vmem>>, vector<16x4xf32>
    %c0_1 = arith.constant 0 : index
    %c0_2 = arith.constant 0 : index
    %1 = vector.load %arg2[%c0_1, %c0_2] : memref<32x16xf32, #tpu.memory_space<vmem>>, vector<32x16xf32>
    %cst = arith.constant dense<0.000000e+00> : vector<32x4xf32>
    %2 = tpu.matmul %1, %0, %cst {dimension_numbers = #tpu.dot_dimension_numbers<[1], [0], [0], [1], [0, 0, 1, 1], [], []>} : vector<32x16xf32>, vector<16x4xf32>, vector<32x4xf32> -> vector<32x4xf32>
    %c0_3 = arith.constant 0 : index
    %c0_4 = arith.constant 0 : index
    %3 = vector.load %arg3[%c0_3, %c0_4] : memref<32x1xf32, #tpu.memory_space<vmem>>, vector<32x1xf32>
    %4 = vector.broadcast %3 : vector<32x1xf32> to vector<32x4xf32>
    %5 = arith.addf %2, %4 : vector<32x4xf32>
    %cst_5 = arith.constant 0.000000e+00 : f32
    %6 = vector.broadcast %cst_5 : f32 to vector<32x4xf32>
    %7 = arith.maximumf %5, %6 : vector<32x4xf32>
    %c0_6 = arith.constant 0 : index
    %c0_7 = arith.constant 0 : index
    %8 = vector.load %arg4[%c0_6, %c0_7] : memref<32x32xf32, #tpu.memory_space<vmem>>, vector<32x32xf32>
    %cst_8 = arith.constant dense<0.000000e+00> : vector<32x4xf32>
    %9 = tpu.matmul %8, %7, %cst_8 {dimension_numbers = #tpu.dot_dimension_numbers<[1], [0], [0], [1], [0, 0, 1, 1], [], []>} : vector<32x32xf32>, vector<32x4xf32>, vector<32x4xf32> -> vector<32x4xf32>
    %c0_9 = arith.constant 0 : index
    %c0_10 = arith.constant 0 : index
    %10 = vector.load %arg5[%c0_9, %c0_10] : memref<32x1xf32, #tpu.memory_space<vmem>>, vector<32x1xf32>
    %11 = vector.broadcast %10 : vector<32x1xf32> to vector<32x4xf32>
    %12 = arith.addf %9, %11 : vector<32x4xf32>
    %cst_11 = arith.constant 0.000000e+00 : f32
    %13 = vector.broadcast %cst_11 : f32 to vector<32x4xf32>
    %14 = arith.maximumf %12, %13 : vector<32x4xf32>
    %c0_12 = arith.constant 0 : index
    %c0_13 = arith.constant 0 : index
    %15 = vector.load %arg6[%c0_12, %c0_13] : memref<8x32xf32, #tpu.memory_space<vmem>>, vector<8x32xf32>
    %cst_14 = arith.constant dense<0.000000e+00> : vector<8x4xf32>
    %16 = tpu.matmul %15, %14, %cst_14 {dimension_numbers = #tpu.dot_dimension_numbers<[1], [0], [0], [1], [0, 0, 1, 1], [], []>} : vector<8x32xf32>, vector<32x4xf32>, vector<8x4xf32> -> vector<8x4xf32>
    %c0_15 = arith.constant 0 : index
    %c0_16 = arith.constant 0 : index
    %17 = vector.load %arg7[%c0_15, %c0_16] : memref<8x1xf32, #tpu.memory_space<vmem>>, vector<8x1xf32>
    %18 = vector.broadcast %17 : vector<8x1xf32> to vector<8x4xf32>
    %19 = arith.addf %16, %18 : vector<8x4xf32>
    %c0_17 = arith.constant 0 : index
    %c0_18 = arith.constant 0 : index
    %20 = vector.load %arg8[%c0_17, %c0_18] : memref<8x4xf32, #tpu.memory_space<vmem>>, vector<8x4xf32>
    tpu.vector_store %arg8[%c0_17, %c0_18], %19 {strides = array<i32>} : memref<8x4xf32, #tpu.memory_space<vmem>>, vector<8x4xf32>,
    return
  }
  func.func @transform_0(%arg0: i32) -> (i32, i32) {
    %c0_i32 = arith.constant 0 : i32
    %c0_i32_0 = arith.constant 0 : i32
    return %c0_i32, %arg0 : i32, i32
  }
  func.func @transform_1(%arg0: i32) -> (i32, i32) {
    %c0_i32 = arith.constant 0 : i32
    %c0_i32_0 = arith.constant 0 : i32
    %c0_i32_1 = arith.constant 0 : i32
    return %c0_i32, %c0_i32_0 : i32, i32
  }
  func.func @transform_2(%arg0: i32) -> (i32, i32) {
    %c0_i32 = arith.constant 0 : i32
    %c0_i32_0 = arith.constant 0 : i32
    %c0_i32_1 = arith.constant 0 : i32
    return %c0_i32, %c0_i32_0 : i32, i32
  }
  func.func @transform_3(%arg0: i32) -> (i32, i32) {
    %c0_i32 = arith.constant 0 : i32
    %c0_i32_0 = arith.constant 0 : i32
    %c0_i32_1 = arith.constant 0 : i32
    return %c0_i32, %c0_i32_0 : i32, i32
  }
  func.func @transform_4(%arg0: i32) -> (i32, i32) {
    %c0_i32 = arith.constant 0 : i32
    %c0_i32_0 = arith.constant 0 : i32
    %c0_i32_1 = arith.constant 0 : i32
    return %c0_i32, %c0_i32_0 : i32, i32
  }
  func.func @transform_5(%arg0: i32) -> (i32, i32) {
    %c0_i32 = arith.constant 0 : i32
    %c0_i32_0 = arith.constant 0 : i32
    %c0_i32_1 = arith.constant 0 : i32
    return %c0_i32, %c0_i32_0 : i32, i32
  }
  func.func @transform_6(%arg0: i32) -> (i32, i32) {
    %c0_i32 = arith.constant 0 : i32
    %c0_i32_0 = arith.constant 0 : i32
    %c0_i32_1 = arith.constant 0 : i32
    return %c0_i32, %c0_i32_0 : i32, i32
  }
  func.func @transform_7(%arg0: i32) -> (i32, i32) {
    %c0_i32 = arith.constant 0 : i32
    %c0_i32_0 = arith.constant 0 : i32
    return %c0_i32, %arg0 : i32, i32
  }
}

</mosaic_0001>

<bundles_post_ra>
// kernel: tpu_custom_call.1
= control target key start
LH: loop header
LB: loop body
LE: loop exit
PB: predicated region body
PF: predicated region fallthrough
CT: control target
= control target key end

     0   :  { %vm56_vm0 = vcmask 130048   ;;  %v442_v3 = vmov 0   ;;  %vm186_vm1 = vcmask 261120   ;;  %v443_v36 = vmov 0.0   ;;  %s557_s0 = inlined_call_operand.vmem [shape: f32[16,4], index: 0, kind: input, shape index: {}]   ;;  %s558_s1 = inlined_call_operand.vmem [shape: f32[32,16], index: 1, kind: input, shape index: {}]   ;;  %s559_s2 = inlined_call_operand.vmem [shape: f32[32,1], index: 2, kind: input, shape index: {}]   ;;  %s560_s4 = inlined_call_operand.vmem [shape: f32[32,1], index: 4, kind: input, shape index: {}]   ;;  %s561_s6 = inlined_call_operand.vmem [shape: f32[8,1], index: 6, kind: input, shape index: {}]   ;;  %s562_s3 = inlined_call_operand.vmem [shape: f32[32,32], index: 3, kind: input, shape index: {}]   ;;  %s563_s5 = inlined_call_operand.vmem [shape: f32[8,32], index: 5, kind: input, shape index: {}]   ;;  %s564_s7 = inlined_call_operand.vmem [shape: f32[8,4], index: 7, kind: output, shape index: {}]  }
   0x1   :  { %v27_v0 = vld [vmem:[%s557_s0 + $0x8] sm:$0xff]  ;;  %v26_v1 = vld [vmem:[%s557_s0] sm:$0xff]  ;;  %440 = vset.pattern.permute.xlu0 %v442_v3  ;;  %441 = vset.pattern.permute.xlu1 %v442_v3  ;;  %v35_v5 = vld [vmem:[%s559_s2 + $0x18] sm:$0xff]  ;;  %vm444_vm2 = vmmov 0   ;;  %vm368_vm3 = vcmask 31744  }
   0x2   :  { %v28_v2 = vld [vmem:[%s558_s1] sm:$0xff]  ;;  %402 = vmatprep.subr.mxu0 %v27_v0  ;;  %v29_v4 = vld [vmem:[%s558_s1 + $0x8] sm:$0xff]  ;;  %v30_v6 = vld [vmem:[%s558_s1 + $0x10] sm:$0xff]  ;;  %53 = vperm.xlu0 %440, %v35_v5  }
   0x3   :  { %406 = vmatprep.mubr.msk.f32.mxu0 %vm56_vm0, %v28_v2  ;;  %403 = vmatpush3.msra.mxu0 %v27_v0  ;;  %v33_v7 = vld [vmem:[%s559_s2 + $0x8] sm:$0xff]  ;;  %v34_v8 = vld [vmem:[%s559_s2 + $0x10] sm:$0xff]  ;;  %v32_v9 = vld [vmem:[%s559_s2] sm:$0xff] }
   0x4   :  { %404 = vmatprep.subr.mxu0 %v26_v1  ;;  %43 = vperm.xlu1 %441, %v33_v7   ;;  %v31_v10 = vld [vmem:[%s558_s1 + $0x18] sm:$0xff]  ;;  %v164_v12 = vld [vmem:[%s560_s4 + $0x10] sm:$0xff]  ;;  %v163_v13 = vld [vmem:[%s560_s4 + $0x8] sm:$0xff] }
   0x5   :  { %405 = vmatpush3.msra.mxu0 %v26_v1  ;;  %v165_v11 = vld [vmem:[%s560_s4 + $0x18] sm:$0xff]  ;;  %v162_v14 = vld [vmem:[%s560_s4] sm:$0xff]  ;;  %v159_v33 = vld [vmem:[%s562_s3 + $0x8] sm:$0xff] }
   0x6   :  { %407 = vmatmul.mubr.msk.f32.vlgmr.msra.gmra.mxu0 %vm56_vm0, %v29_v4  ;;  %48 = vperm.xlu0 %440, %v34_v8   ;;  %v289_v15 = vld [vmem:[%s561_s6] sm:$0xff]  ;;  %v160_v34 = vld [vmem:[%s562_s3 + $0x10] sm:$0xff]  ;;  %v161_v35 = vld [vmem:[%s562_s3 + $0x18] sm:$0xff] }
   0x7   :  { %409 = vmatprep.mubr.msk.f32.mxu0 %vm56_vm0, %v30_v6  ;;  %v158_v16 = vld [vmem:[%s562_s3] sm:$0xff]  ;;  %426 = vmatprep.subr.mxu0 %v443_v36 }
   0x8   :  { %38 = vperm.xlu1 %441, %v32_v9   ;;  %420 = vmatprep.mubr.msk.f32.mxu1 %vm186_vm1, %v158_v16  ;;  %v288_v53 = vld [vmem:[%s563_s5] sm:$0xff] }
   0xa   :  { %410 = vmatmul.mubr.msk.f32.gmra.mxu0 %vm56_vm0, %v31_v10  ;;  %183 = vperm.xlu0 %440, %v165_v11  }
   0xb   :  { %434 = vmatprep.mubr.msk.f32.mxu0 %vm444_vm2, %v443_v36 }
   0xc   :  { %178 = vperm.xlu1 %441, %v164_v12  }
   0xe   :  { %173 = vperm.xlu0 %440, %v163_v13  }
  0x10   :  { %168 = vperm.xlu1 %441, %v162_v14  }
  0x12   :  { %292 = vperm.xlu0 %440, %v289_v15  }
  0x7d   :  { %v54_v17 = vpop.permute.xlu0 %53 }
  0x7f   :  { %v44_v19 = vpop.permute.xlu1 %43 }
  0x81   :  { %v49_v23 = vpop.permute.xlu0 %48 }
  0x83   :  { %v39_v28 = vpop.permute.xlu1 %38 }
  0x85   :  { %v184_v37 = vpop.permute.xlu0 %183 }
  0x87   :  { %v179_v39 = vpop.permute.xlu1 %178 }
  0x89   :  { %v174_v43 = vpop.permute.xlu0 %173 }
  0x8b   :  { %v169_v48 = vpop.permute.xlu1 %168 }
  0x8d   :  { %v293_v54 = vpop.permute.xlu0 %292 }
  0xc6   :  { %v408_v18 = vpop.f32.mrf.mxu0 }
  0xc7   :  { %v141_v25 = vadd.f32 %v408_v18, %v44_v19 }
  0xc8   :  { %v135_v20 = vpop.f32.mrf.mxu0 }
  0xc9   :  { %v136_v29 = vadd.f32 %v135_v20, %v39_v28  ;;  %v155_v31 = vmax.f32 %v141_v25, 0.0 }
  0xca   :  { %v411_v21 = vpop.f32.mrf.mxu0 }
  0xcb   :  { %v151_v22 = vadd.f32 %v411_v21, %v54_v17  ;;  %v154_v32 = vmax.f32 %v136_v29, 0.0 }
  0xcc   :  { %v145_v24 = vpop.f32.mrf.mxu0 }
  0xcd   :  { %v157_v26 = vmax.f32 %v151_v22, 0.0  ;;  %v146_v27 = vadd.f32 %v145_v24, %v49_v23 }
  0xcf   :  { %v156_v30 = vmax.f32 %v146_v27, 0.0  ;;  %412 = vmatprep.subr.mxu1 %v157_v26 }
  0xd0   :  { %413 = vmatpush3.msra.mxu1 %v157_v26 }
  0xd1   :  { %414 = vmatprep.subr.mxu1 %v156_v30 }
  0xd2   :  { %415 = vmatpush3.msra.mxu1 %v156_v30 }
  0xd3   :  { %416 = vmatprep.subr.mxu1 %v155_v31 }
  0xd4   :  { %417 = vmatpush3.msra.mxu1 %v155_v31 }
  0xd5   :  { %418 = vmatprep.subr.mxu1 %v154_v32 }
  0xd6   :  { %419 = vmatpush3.msra.mxu1 %v154_v32 }
  0xd7   :  { %421 = vmatmul.mubr.msk.f32.vlgmr.msra.gmra.mxu1 %vm186_vm1, %v159_v33 }
  0xd8   :  { %423 = vmatprep.mubr.msk.f32.mxu1 %vm186_vm1, %v160_v34 }
  0xdb   :  { %424 = vmatmul.mubr.msk.f32.gmra.mxu1 %vm186_vm1, %v161_v35 }
 0x197   :  { %v422_v38 = vpop.f32.mrf.mxu1 }
 0x198   :  { %v271_v45 = vadd.f32 %v422_v38, %v174_v43 }
 0x199   :  { %v265_v40 = vpop.f32.mrf.mxu1 }
 0x19a   :  { %v266_v49 = vadd.f32 %v265_v40, %v169_v48  ;;  %v285_v51 = vmax.f32 %v271_v45, 0.0 }
 0x19b   :  { %v425_v41 = vpop.f32.mrf.mxu1 }
 0x19c   :  { %v281_v42 = vadd.f32 %v425_v41, %v184_v37  ;;  %v284_v52 = vmax.f32 %v266_v49, 0.0 }
 0x19d   :  { %v275_v44 = vpop.f32.mrf.mxu1 }
 0x19e   :  { %v287_v46 = vmax.f32 %v281_v42, 0.0  ;;  %v276_v47 = vadd.f32 %v275_v44, %v179_v39 }
 0x1a0   :  { %v286_v50 = vmax.f32 %v276_v47, 0.0  ;;  %427 = vmatpush3.msra.mxu0 %v287_v46 }
 0x1a1   :  { %428 = vmatprep.subr.mxu0 %v443_v36 }
 0x1a2   :  { %429 = vmatpush3.msra.mxu0 %v286_v50 }
 0x1a3   :  { %430 = vmatprep.subr.mxu0 %v443_v36 }
 0x1a4   :  { %431 = vmatpush3.msra.mxu0 %v285_v51 }
 0x1a5   :  { %432 = vmatprep.subr.mxu0 %v443_v36 }
 0x1a6   :  { %433 = vmatpush3.msra.mxu0 %v284_v52 }
 0x1a7   :  { %435 = vmatmul.mubr.msk.f32.vlgmr.msra.gmra.mxu0 %vm186_vm1, %v288_v53 }
 0x267   :  { %v364_v55 = vpop.f32.mrf.mxu0 }
 0x268   :  { %v365_v56 = vadd.f32 %v364_v55, %v293_v54 }
 0x269   :  { %v436_v57 = vpop.f32.mrf.mxu0 }
 0x26a   :  { %369 = vst.msk [vmem:[%s564_s7] sm:$0xff] %vm368_vm3, %v365_v56 }

</bundles_post_ra>
